<compile_context>
chip_gen: v7x
topology: tpu7x:2x2x1
jax: 0.10.0
libtpu: 0.0.40
codegen_flags: <defaults>
</compile_context>

<pallas_src>
import math

import jax
import jax.numpy as jnp
from jax import lax
from jax.experimental import pallas as pl
from jax.experimental.pallas import tpu as pltpu


def _seg_reduce(x, seg, combine):
    """Reduce-and-broadcast `combine` over aligned groups of `seg` lanes.

    x: (rows, lanes) with lanes % seg == 0 and seg a power of two.  Implemented
    as a log2(seg)-step XOR butterfly of native lane rotations.  The select
    mask is derived from rotations of a lane-index iota computed with the same
    primitive, so the result does not depend on pltpu.roll's direction
    convention.
    """
    if seg == 1:
        return x
    lanes = x.shape[-1]
    lane = lax.broadcasted_iota(jnp.int32, (1, lanes), 1)
    y = x
    s = 1
    while s < seg:
        src_a = pltpu.roll(lane, s, axis=1)            # source lane of rotation `s`
        use_a = src_a == (lane ^ s)                    # does rotation `s` deliver lane i^s?
        a = pltpu.roll(y, s, axis=1)
        b = pltpu.roll(y, lanes - s, axis=1)           # the opposite rotation
        y = combine(y, jnp.where(use_a, a, b))
        s *= 2
    return y


def _make_kernel(k_comp, lanes, with_probs):
    """Kernel over a (rows, lanes) view; each lane-row = lanes // k_comp groups."""
    groups = lanes // k_comp
    log2k = k_comp.bit_length() - 1

    def kernel(b_ref, k_ref, v_ref, out_ref, *p_ref):
        f32 = jnp.float32
        x = k_ref[...].astype(f32) + b_ref[...].astype(f32)      # (TR, lanes)
        m = _seg_reduce(x, k_comp, jnp.maximum)                  # group max, broadcast
        e = jnp.exp(x - m)
        denom = _seg_reduce(e, k_comp, jnp.add)                  # group sum, broadcast
        probs = e / denom                                        # exact divide (review item)
        if with_probs:
            p_ref[0][...] = probs.astype(p_ref[0].dtype)
        pv = probs * v_ref[...].astype(f32)

        # Group-compressing sum on the MXU: sel[c, g] = 1 iff lane c is in group g.
        # bf16-head / f32-residual split keeps the result ~f32-accurate even if
        # the MXU lowers the f32 matmul to bf16 passes.
        sel = ((lax.broadcasted_iota(jnp.int32, (lanes, groups), 0) >> log2k)
               == lax.broadcasted_iota(jnp.int32, (lanes, groups), 1)).astype(f32)
        hi = pv.astype(jnp.bfloat16).astype(f32)
        lo = pv - hi
        out = (jnp.dot(hi, sel, preferred_element_type=f32)
               + jnp.dot(lo, sel, preferred_element_type=f32))   # (TR, groups)
        out_ref[...] = out.astype(out_ref.dtype)

    return kernel


def _row_block(rows, lanes, itemsize, with_probs):
    """Row-tile size from a VMEM budget that counts I/O double-buffers *and*
    the ~6 full-tile f32 intermediates (logits / butterfly states / e / probs /
    pv / hi-lo) the kernel materialises (review item)."""
    n_io = 8 if with_probs else 6          # 2 x (keys + values [+ probs] + out), lane-padded
    per_row = lanes * (n_io * itemsize + 6 * 4)
    budget = 28 * 1024 * 1024
    cap = max(8, min(budget // per_row, 8192))
    if rows <= cap:
        return rows                        # single full-extent row block
    return max(8, (cap // 8) * 8)


def biased_attention(keys, values, biases, dim=-1, return_probs=True):
    """Pallas forward of BiasedAttention.

    keys/values: (..., K) along `dim`; biases: (K,).  Returns (out, probs)
    exactly like the torch module, or just `out` when return_probs=False.
    """
    assert keys.shape == values.shape
    num_k = int(biases.shape[0])
    out_dtype = keys.dtype

    # Mirror torch: move `dim` to the last (reduction) axis.
    keys_t = jnp.swapaxes(keys, -1, dim)
    values_t = jnp.swapaxes(values, -1, dim)
    assert keys_t.shape[-1] == num_k
    batch_shape = keys_t.shape[:-1]
    n_rows = int(math.prod(batch_shape)) if batch_shape else 1

    k_pad = 1 << (num_k - 1).bit_length()      # next power of two (>= 1)
    if k_pad > 128:
        # TODO(synk): lane-group kernel needs num_components <= 128 after
        # power-of-two padding; fall back to plain XLA for larger K.
        probs = jax.nn.softmax(keys_t + biases, axis=-1)
        out = jnp.sum(probs * values_t, axis=-1)
        if out.ndim:
            out = jnp.swapaxes(out, -1, dim)
        probs = jnp.swapaxes(probs, -1, dim)
        return (out, probs) if return_probs else out

    keys2d = keys_t.reshape(n_rows, num_k)
    values2d = values_t.reshape(n_rows, num_k)
    biases_p = biases
    if k_pad != num_k:
        # One-off pad copy (non-power-of-two K only): padded components get a
        # ~-inf key (prob -> 0) and zero value, so results are unchanged.
        keys2d = jnp.pad(keys2d, ((0, 0), (0, k_pad - num_k)), constant_values=-1e30)
        values2d = jnp.pad(values2d, ((0, 0), (0, k_pad - num_k)))
        biases_p = jnp.pad(biases, (0, k_pad - num_k))

    lanes = 128                         # kernel lane width (one vreg row, intra-vreg rolls)
    groups = lanes // k_pad             # component-groups per lane-row
    total = n_rows * k_pad
    rows = (total + lanes - 1) // lanes
    tail = rows * lanes - total

    keys_flat = keys2d.reshape(-1)      # contiguous -> zero-copy for dim == -1
    values_flat = values2d.reshape(-1)
    if tail:
        # Tail pad so the flat view tiles into (rows, 128); the pad forms whole
        # garbage groups that are sliced off below.
        keys_flat = jnp.pad(keys_flat, (0, tail))
        values_flat = jnp.pad(values_flat, (0, tail))
    keys_v = keys_flat.reshape(rows, lanes)
    values_v = values_flat.reshape(rows, lanes)
    bias_row = jnp.tile(biases_p, groups).reshape(1, lanes)

    itemsize = jnp.dtype(out_dtype).itemsize
    tr = _row_block(rows, lanes, itemsize, return_probs)
    grid = (pl.cdiv(rows, tr),)

    out_shapes = [jax.ShapeDtypeStruct((rows, groups), out_dtype)]
    out_specs = [pl.BlockSpec((tr, groups), lambda i: (i, 0))]
    if return_probs:
        out_shapes.append(jax.ShapeDtypeStruct((rows, lanes), out_dtype))
        out_specs.append(pl.BlockSpec((tr, lanes), lambda i: (i, 0)))

    cost = pl.CostEstimate(
        flops=(30 + 4 * groups) * rows * lanes,
        transcendentals=rows * lanes,
        bytes_accessed=(2 + (1 if return_probs else 0)) * rows * lanes * itemsize
        + rows * groups * itemsize,
    )

    res = pl.pallas_call(
        _make_kernel(k_pad, lanes, return_probs),
        out_shape=tuple(out_shapes),
        grid_spec=pltpu.PrefetchScalarGridSpec(
            num_scalar_prefetch=0,
            grid=grid,
            in_specs=[
                pl.BlockSpec((1, lanes), lambda i: (0, 0)),      # bias row (resident)
                pl.BlockSpec((tr, lanes), lambda i: (i, 0)),     # keys view
                pl.BlockSpec((tr, lanes), lambda i: (i, 0)),     # values view
            ],
            out_specs=tuple(out_specs),
        ),
        compiler_params=pltpu.CompilerParams(
            dimension_semantics=("parallel",),                   # megacore sharding on v7x
            vmem_limit_bytes=48 * 1024 * 1024,
        ),
        cost_estimate=cost,
    )(bias_row, keys_v, values_v)
    if not isinstance(res, (tuple, list)):
        res = (res,)

    out = res[0].reshape(-1)[:n_rows].reshape(batch_shape)
    if out.ndim:
        out = jnp.swapaxes(out, -1, dim)       # mirrors torch's out.transpose(-1, dim)
    if not return_probs:
        return out

    probs2d = res[1].reshape(-1)[: n_rows * k_pad].reshape(n_rows, k_pad)
    if k_pad != num_k:
        probs2d = probs2d[:, :num_k]
    probs = probs2d.reshape(batch_shape + (num_k,))
    probs = jnp.swapaxes(probs, -1, dim)
    return out, probs


def biased_attention_ref(keys, values, biases, dim=-1):
    """Plain-JAX mirror of the torch module (including out.transpose(-1, dim))."""
    keys_t = jnp.swapaxes(keys, -1, dim)
    values_t = jnp.swapaxes(values, -1, dim)
    probs = jax.nn.softmax(keys_t + biases, axis=-1)
    out = jnp.sum(probs * values_t, axis=-1)
    if out.ndim:
        out = jnp.swapaxes(out, -1, dim)
    probs = jnp.swapaxes(probs, -1, dim)
    return out, probs


if __name__ == "__main__":
    key = jax.random.PRNGKey(0)
    k1, k2, k3, k4 = jax.random.split(key, 4)

    # --- small shape matching the module (num_components = 8) -------------------
    B, S, K = 2, 16, 8
    keys_in = jax.random.normal(k1, (B, S, K), dtype=jnp.float32)
    values_in = jax.random.normal(k2, (B, S, K), dtype=jnp.float32)
    biases = jnp.linspace(-0.5, 0.5, K, dtype=jnp.float32)   # non-zero bias path

    out, probs = biased_attention(keys_in, values_in, biases)
    jax.block_until_ready((out, probs))
    out_ref, probs_ref = biased_attention_ref(keys_in, values_in, biases)
    assert out.shape == (B, S) and probs.shape == (B, S, K)
    assert jnp.allclose(probs, probs_ref, atol=1e-5, rtol=1e-5)
    assert jnp.allclose(probs.sum(-1), 1.0, atol=1e-5)       # exact divide -> sums to 1
    assert jnp.allclose(out, out_ref, atol=1e-4, rtol=1e-4)

    # --- non-last reduction dim (components on axis 0) --------------------------
    keys_d0 = jax.random.normal(k3, (K, B, S), dtype=jnp.float32)
    values_d0 = jax.random.normal(k4, (K, B, S), dtype=jnp.float32)
    out0, probs0 = biased_attention(keys_d0, values_d0, biases, dim=0)
    out0_ref, probs0_ref = biased_attention_ref(keys_d0, values_d0, biases, dim=0)
    assert out0.shape == out0_ref.shape and probs0.shape == probs0_ref.shape
    assert jnp.allclose(probs0, probs0_ref, atol=1e-5, rtol=1e-5)
    assert jnp.allclose(out0, out0_ref, atol=1e-4, rtol=1e-4)

    # --- non-power-of-two component count (exercises K padding) -----------------
    K6 = 6
    biases6 = jnp.linspace(-0.3, 0.3, K6, dtype=jnp.float32)
    keys6 = jax.random.normal(k1, (B, S, K6), dtype=jnp.float32)
    values6 = jax.random.normal(k2, (B, S, K6), dtype=jnp.float32)
    out6, probs6 = biased_attention(keys6, values6, biases6)
    out6_ref, probs6_ref = biased_attention_ref(keys6, values6, biases6)
    assert jnp.allclose(probs6, probs6_ref, atol=1e-5, rtol=1e-5)
    assert jnp.allclose(out6, out6_ref, atol=1e-4, rtol=1e-4)

    # --- larger shape: multi-block grid, partial last row-block, tail padding ---
    B2, S2 = 4, 20001                    # N = 80004 -> rows = 5001 (2 blocks, partial tail)
    kk1, kk2 = jax.random.split(k3)
    keys2 = jax.random.normal(kk1, (B2, S2, K), dtype=jnp.float32)
    values2 = jax.random.normal(kk2, (B2, S2, K), dtype=jnp.float32)
    out2, probs2 = biased_attention(keys2, values2, biases)
    jax.block_until_ready((out2, probs2))
    out2_ref, probs2_ref = biased_attention_ref(keys2, values2, biases)
    assert jnp.allclose(probs2, probs2_ref, atol=1e-5, rtol=1e-5)
    assert jnp.allclose(out2, out2_ref, atol=1e-4, rtol=1e-4)

    # --- out-only fast path (drops the probs output / writeback) ----------------
    out_only = biased_attention(keys2, values2, biases, return_probs=False)
    jax.block_until_ready(out_only)
    assert jnp.allclose(out_only, out2_ref, atol=1e-4, rtol=1e-4)

    print("KERNEL_OK")
</pallas_src>

<mosaic_0001>
module attributes {stable_mosaic.version = 11 : i64} {
  func.func @kernel(%arg0: i32, %arg1: memref<1x128xf32, #tpu.memory_space<vmem>>, %arg2: memref<2x128xf32, #tpu.memory_space<vmem>>, %arg3: memref<2x128xf32, #tpu.memory_space<vmem>>, %arg4: memref<2x16xf32, #tpu.memory_space<vmem>>, %arg5: memref<2x128xf32, #tpu.memory_space<vmem>>) attributes {dimension_semantics = [#tpu.dimension_semantics<parallel>], iteration_bounds = array<i64: 1>, scalar_prefetch = 0 : i64, scratch_operands = 0 : i64, tpu.core_type = #tpu.core_type<tc>, window_params = [{pipeline_mode = #tpu.pipeline_mode<synchronous>, transform_indices = @transform_0, window_bounds = array<i64: 1, 128>}, {transform_indices = @transform_1, window_bounds = array<i64: 2, 128>}, {transform_indices = @transform_2, window_bounds = array<i64: 2, 128>}, {transform_indices = @transform_3, window_bounds = array<i64: 2, 16>}, {transform_indices = @transform_4, window_bounds = array<i64: 2, 128>}]} {
    %c0 = arith.constant 0 : index
    %c0_0 = arith.constant 0 : index
    %0 = vector.load %arg2[%c0, %c0_0] : memref<2x128xf32, #tpu.memory_space<vmem>>, vector<2x128xf32>
    %c0_1 = arith.constant 0 : index
    %c0_2 = arith.constant 0 : index
    %1 = vector.load %arg1[%c0_1, %c0_2] : memref<1x128xf32, #tpu.memory_space<vmem>>, vector<1x128xf32>
    %2 = vector.broadcast %1 : vector<1x128xf32> to vector<2x128xf32>
    %3 = arith.addf %0, %2 : vector<2x128xf32>
    %4 = tpu.iota {dimensions = array<i32: 1>} : vector<1x128xi32>
    %c1_i32 = arith.constant 1 : i32
    %5 = tpu.dynamic_rotate %4 by %c1_i32 dim 1 : vector<1x128xi32>, i32 -> vector<1x128xi32>
    %c1_i32_3 = arith.constant 1 : i32
    %6 = vector.broadcast %c1_i32_3 : i32 to vector<1x128xi32>
    %7 = arith.xori %4, %6 : vector<1x128xi32>
    %8 = arith.cmpi eq, %5, %7 : vector<1x128xi32>
    %c1_i32_4 = arith.constant 1 : i32
    %9 = tpu.dynamic_rotate %3 by %c1_i32_4 dim 1 : vector<2x128xf32>, i32 -> vector<2x128xf32>
    %c127_i32 = arith.constant 127 : i32
    %10 = tpu.dynamic_rotate %3 by %c127_i32 dim 1 : vector<2x128xf32>, i32 -> vector<2x128xf32>
    %11 = vector.shape_cast %8 : vector<1x128xi1> to vector<1x128xi1>
    %12 = vector.broadcast %11 : vector<1x128xi1> to vector<2x128xi1>
    %13 = arith.select %12, %9, %10 : vector<2x128xi1>, vector<2x128xf32>
    %14 = arith.maximumf %3, %13 : vector<2x128xf32>
    %c2_i32 = arith.constant 2 : i32
    %15 = tpu.dynamic_rotate %4 by %c2_i32 dim 1 : vector<1x128xi32>, i32 -> vector<1x128xi32>
    %c2_i32_5 = arith.constant 2 : i32
    %16 = vector.broadcast %c2_i32_5 : i32 to vector<1x128xi32>
    %17 = arith.xori %4, %16 : vector<1x128xi32>
    %18 = arith.cmpi eq, %15, %17 : vector<1x128xi32>
    %c2_i32_6 = arith.constant 2 : i32
    %19 = tpu.dynamic_rotate %14 by %c2_i32_6 dim 1 : vector<2x128xf32>, i32 -> vector<2x128xf32>
    %c126_i32 = arith.constant 126 : i32
    %20 = tpu.dynamic_rotate %14 by %c126_i32 dim 1 : vector<2x128xf32>, i32 -> vector<2x128xf32>
    %21 = vector.shape_cast %18 : vector<1x128xi1> to vector<1x128xi1>
    %22 = vector.broadcast %21 : vector<1x128xi1> to vector<2x128xi1>
    %23 = arith.select %22, %19, %20 : vector<2x128xi1>, vector<2x128xf32>
    %24 = arith.maximumf %14, %23 : vector<2x128xf32>
    %c4_i32 = arith.constant 4 : i32
    %25 = tpu.dynamic_rotate %4 by %c4_i32 dim 1 : vector<1x128xi32>, i32 -> vector<1x128xi32>
    %c4_i32_7 = arith.constant 4 : i32
    %26 = vector.broadcast %c4_i32_7 : i32 to vector<1x128xi32>
    %27 = arith.xori %4, %26 : vector<1x128xi32>
    %28 = arith.cmpi eq, %25, %27 : vector<1x128xi32>
    %c4_i32_8 = arith.constant 4 : i32
    %29 = tpu.dynamic_rotate %24 by %c4_i32_8 dim 1 : vector<2x128xf32>, i32 -> vector<2x128xf32>
    %c124_i32 = arith.constant 124 : i32
    %30 = tpu.dynamic_rotate %24 by %c124_i32 dim 1 : vector<2x128xf32>, i32 -> vector<2x128xf32>
    %31 = vector.shape_cast %28 : vector<1x128xi1> to vector<1x128xi1>
    %32 = vector.broadcast %31 : vector<1x128xi1> to vector<2x128xi1>
    %33 = arith.select %32, %29, %30 : vector<2x128xi1>, vector<2x128xf32>
    %34 = arith.maximumf %24, %33 : vector<2x128xf32>
    %35 = arith.subf %3, %34 : vector<2x128xf32>
    %36 = math.exp %35 : vector<2x128xf32>
    %37 = tpu.iota {dimensions = array<i32: 1>} : vector<1x128xi32>
    %c1_i32_9 = arith.constant 1 : i32
    %38 = tpu.dynamic_rotate %37 by %c1_i32_9 dim 1 : vector<1x128xi32>, i32 -> vector<1x128xi32>
    %c1_i32_10 = arith.constant 1 : i32
    %39 = vector.broadcast %c1_i32_10 : i32 to vector<1x128xi32>
    %40 = arith.xori %37, %39 : vector<1x128xi32>
    %41 = arith.cmpi eq, %38, %40 : vector<1x128xi32>
    %c1_i32_11 = arith.constant 1 : i32
    %42 = tpu.dynamic_rotate %36 by %c1_i32_11 dim 1 : vector<2x128xf32>, i32 -> vector<2x128xf32>
    %c127_i32_12 = arith.constant 127 : i32
    %43 = tpu.dynamic_rotate %36 by %c127_i32_12 dim 1 : vector<2x128xf32>, i32 -> vector<2x128xf32>
    %44 = vector.shape_cast %41 : vector<1x128xi1> to vector<1x128xi1>
    %45 = vector.broadcast %44 : vector<1x128xi1> to vector<2x128xi1>
    %46 = arith.select %45, %42, %43 : vector<2x128xi1>, vector<2x128xf32>
    %47 = arith.addf %36, %46 : vector<2x128xf32>
    %c2_i32_13 = arith.constant 2 : i32
    %48 = tpu.dynamic_rotate %37 by %c2_i32_13 dim 1 : vector<1x128xi32>, i32 -> vector<1x128xi32>
    %c2_i32_14 = arith.constant 2 : i32
    %49 = vector.broadcast %c2_i32_14 : i32 to vector<1x128xi32>
    %50 = arith.xori %37, %49 : vector<1x128xi32>
    %51 = arith.cmpi eq, %48, %50 : vector<1x128xi32>
    %c2_i32_15 = arith.constant 2 : i32
    %52 = tpu.dynamic_rotate %47 by %c2_i32_15 dim 1 : vector<2x128xf32>, i32 -> vector<2x128xf32>
    %c126_i32_16 = arith.constant 126 : i32
    %53 = tpu.dynamic_rotate %47 by %c126_i32_16 dim 1 : vector<2x128xf32>, i32 -> vector<2x128xf32>
    %54 = vector.shape_cast %51 : vector<1x128xi1> to vector<1x128xi1>
    %55 = vector.broadcast %54 : vector<1x128xi1> to vector<2x128xi1>
    %56 = arith.select %55, %52, %53 : vector<2x128xi1>, vector<2x128xf32>
    %57 = arith.addf %47, %56 : vector<2x128xf32>
    %c4_i32_17 = arith.constant 4 : i32
    %58 = tpu.dynamic_rotate %37 by %c4_i32_17 dim 1 : vector<1x128xi32>, i32 -> vector<1x128xi32>
    %c4_i32_18 = arith.constant 4 : i32
    %59 = vector.broadcast %c4_i32_18 : i32 to vector<1x128xi32>
    %60 = arith.xori %37, %59 : vector<1x128xi32>
    %61 = arith.cmpi eq, %58, %60 : vector<1x128xi32>
    %c4_i32_19 = arith.constant 4 : i32
    %62 = tpu.dynamic_rotate %57 by %c4_i32_19 dim 1 : vector<2x128xf32>, i32 -> vector<2x128xf32>
    %c124_i32_20 = arith.constant 124 : i32
    %63 = tpu.dynamic_rotate %57 by %c124_i32_20 dim 1 : vector<2x128xf32>, i32 -> vector<2x128xf32>
    %64 = vector.shape_cast %61 : vector<1x128xi1> to vector<1x128xi1>
    %65 = vector.broadcast %64 : vector<1x128xi1> to vector<2x128xi1>
    %66 = arith.select %65, %62, %63 : vector<2x128xi1>, vector<2x128xf32>
    %67 = arith.addf %57, %66 : vector<2x128xf32>
    %68 = arith.divf %36, %67 : vector<2x128xf32>
    %c0_21 = arith.constant 0 : index
    %c0_22 = arith.constant 0 : index
    %69 = vector.load %arg5[%c0_21, %c0_22] : memref<2x128xf32, #tpu.memory_space<vmem>>, vector<2x128xf32>
    tpu.vector_store %arg5[%c0_21, %c0_22], %68 {strides = array<i32>} : memref<2x128xf32, #tpu.memory_space<vmem>>, vector<2x128xf32>,
    %c0_23 = arith.constant 0 : index
    %c0_24 = arith.constant 0 : index
    %70 = vector.load %arg3[%c0_23, %c0_24] : memref<2x128xf32, #tpu.memory_space<vmem>>, vector<2x128xf32>
    %71 = arith.mulf %68, %70 : vector<2x128xf32>
    %72 = tpu.iota {dimensions = array<i32: 0>} : vector<128x16xi32>
    %c3_i32 = arith.constant 3 : i32
    %73 = vector.broadcast %c3_i32 : i32 to vector<128x16xi32>
    %74 = arith.shrsi %72, %73 : vector<128x16xi32>
    %75 = tpu.iota {dimensions = array<i32: 1>} : vector<128x16xi32>
    %76 = arith.cmpi eq, %74, %75 : vector<128x16xi32>
    %77 = arith.extui %76 : vector<128x16xi1> to vector<128x16xi32>
    %78 = arith.sitofp %77 : vector<128x16xi32> to vector<128x16xf32>
    %79 = arith.truncf %71 : vector<2x128xf32> to vector<2x128xbf16>
    %80 = arith.extf %79 : vector<2x128xbf16> to vector<2x128xf32>
    %81 = arith.subf %71, %80 : vector<2x128xf32>
    %cst = arith.constant dense<0.000000e+00> : vector<2x16xf32>
    %82 = tpu.matmul %80, %78, %cst {dimension_numbers = #tpu.dot_dimension_numbers<[1], [0], [0], [1], [0, 0, 1, 1], [], []>} : vector<2x128xf32>, vector<128x16xf32>, vector<2x16xf32> -> vector<2x16xf32>
    %cst_25 = arith.constant dense<0.000000e+00> : vector<2x16xf32>
    %83 = tpu.matmul %81, %78, %cst_25 {dimension_numbers = #tpu.dot_dimension_numbers<[1], [0], [0], [1], [0, 0, 1, 1], [], []>} : vector<2x128xf32>, vector<128x16xf32>, vector<2x16xf32> -> vector<2x16xf32>
    %84 = arith.addf %82, %83 : vector<2x16xf32>
    %c0_26 = arith.constant 0 : index
    %c0_27 = arith.constant 0 : index
    %85 = vector.load %arg4[%c0_26, %c0_27] : memref<2x16xf32, #tpu.memory_space<vmem>>, vector<2x16xf32>
    tpu.vector_store %arg4[%c0_26, %c0_27], %84 {strides = array<i32>} : memref<2x16xf32, #tpu.memory_space<vmem>>, vector<2x16xf32>,
    return
  }
  func.func @transform_0(%arg0: i32) -> (i32, i32) {
    %c0_i32 = arith.constant 0 : i32
    %c0_i32_0 = arith.constant 0 : i32
    %c0_i32_1 = arith.constant 0 : i32
    return %c0_i32, %c0_i32_0 : i32, i32
  }
  func.func @transform_1(%arg0: i32) -> (i32, i32) {
    %c0_i32 = arith.constant 0 : i32
    %c0_i32_0 = arith.constant 0 : i32
    return %arg0, %c0_i32 : i32, i32
  }
  func.func @transform_2(%arg0: i32) -> (i32, i32) {
    %c0_i32 = arith.constant 0 : i32
    %c0_i32_0 = arith.constant 0 : i32
    return %arg0, %c0_i32 : i32, i32
  }
  func.func @transform_3(%arg0: i32) -> (i32, i32) {
    %c0_i32 = arith.constant 0 : i32
    %c0_i32_0 = arith.constant 0 : i32
    return %arg0, %c0_i32 : i32, i32
  }
  func.func @transform_4(%arg0: i32) -> (i32, i32) {
    %c0_i32 = arith.constant 0 : i32
    %c0_i32_0 = arith.constant 0 : i32
    return %arg0, %c0_i32 : i32, i32
  }
}

</mosaic_0001>

<bundles_post_ra>
// kernel: tpu_custom_call.1
= control target key start
LH: loop header
LB: loop body
LE: loop exit
PB: predicated region body
PF: predicated region fallthrough
CT: control target
= control target key end

     0   :  { %10 = vsyncpa [#allocation3], 0  ;;  %s899_s0 = inlined_call_operand.hbm [shape: f32[1,128], index: 0, kind: input, shape index: {}]   ;;  %s900_s1 = inlined_call_operand.vmem [shape: f32[2,128], index: 1, kind: input, shape index: {}]   ;;  %s901_s2 = inlined_call_operand.vmem [shape: f32[2,128], index: 2, kind: input, shape index: {}]   ;;  %s902_s3 = inlined_call_operand.hbm [shape: f32[2,16], index: 3, kind: output, shape index: {0}]   ;;  %s903_s4 = inlined_call_operand.hbm [shape: f32[2,128], index: 4, kind: output, shape index: {1}]  }
   0x1   :  { %11 = vsyncpa [#allocation4], 0 }
   0x2   :  { %12 = vsyncpa [#allocation7], 0  ;;  %s662_s15 = smov [#allocation2]   ;;  %s590_s19 = scalar_lea.hbm %s899_s0, 16 }
   0x3   :  { %s19_s16 = sshll.u32 %s662_s15, 4  ;;  %p591_p0 = scmp.ne.s32.totalorder %s899_s0, %s590_s19  ;;  %s20_s16 = int_to_ptr.vmem [resolvable:$true] %s19_s16 }
   0x4   :  { %p594_p1 = scmp.lt.u32.totalorder %s590_s19, %s899_s0 }
   0x6   :  { %p596_p2 = pnand %p594_p1, %p591_p0 }
   0x8   :  { %599 = shalt.err (!%p596_p2)
}
   0x9   :  { %s600_s24 = scalar_lea.vmem %s20_s16, 16  ;;  %s604_s25 = scalar_lea.vmem %s20_s16, 32 }
   0xa   :  { %p601_p3 = scmp.ne.s32.totalorder %s20_s16, %s600_s24  ;;  %p605_p4 = scmp.lt.s32.totalorder %s20_s16, %s20_s16 }
   0xb   :  { %p606_p5 = scmp.lt.s32.totalorder %s604_s25, %s600_s24 }
   0xd   :  { %p607_p6 = por %p606_p5, %p605_p4 }
   0xf   :  { %p608_p7 = pnand %p607_p6, %p601_p3 }
  0x11   :  { %611 = shalt.err (!%p608_p7)
}
  0x12   :  { %22 = dma.hbm_to_vmem [thread:$0]  %s899_s0, 16, %s20_s16, [#allocation3]  }
  0x13   :  { %656 = dma.done.wait [#allocation3], 16  }
  0x14   :  { %657 = vsyncadd [#allocation3], 4294967280  ;;  %v39_v0 = vlaneseq  ;;  %s663_s28 = smov 1   ;;  %v30_v2 = vld [vmem:[%s900_s1] sm:$0x3]  ;;  %s664_s5 = smov 127  }
  0x15   :  { %v370_v3 = vld [vmem:[#allocation2] ss:$0 sm:$0xff]  ;;  %s665_s0 = smov 2   ;;  %v666_v9 = vmov 0   ;;  %s667_s1 = smov 126   ;;  %v670_v40 = vmov 0.0|0.0  }
  0x16   :  { %v713_v1 = vand.u32 127, %v39_v0  ;;  %v38_v4 = vadd.f32 %v370_v3, %v30_v2  ;;  %v724_v5 = vshrl.u32 %v39_v0, 7  ;;  %s668_s6 = smov 4   ;;  %s669_s7 = smov 124   ;;  %547 = vmatprep.subr.bf16.mxu0 %v670_v40  ;;  %523 = vmatprep.subr.bf16.mxu1 %v670_v40  ;;  %v671_v54 = vmov 1.0|1.0  }
  0x17   :  { %s674_s10 = smov [#allocation6]  }
  0x18   :  { %41 = vrot.lane.b32.xlu0 %v713_v1, %s663_s28  ;;  %47 = vrot.lane.b32.xlu1 %v38_v4, %s664_s5  ;;  %v43_v6 = vxor.u32 1, %v713_v1  ;;  %v52_v7 = vsub.s32 0, %v724_v5  ;;  %v59_v17 = vxor.u32 2, %v713_v1  ;;  %v75_v26 = vxor.u32 4, %v713_v1  ;;  %s357_s11 = sshll.u32 %s674_s10, 4  ;;  %s358_s11 = int_to_ptr.vmem [resolvable:$true] %s357_s11 }
  0x19   :  { %v117_v38 = vadd.s32 8, %v724_v5  ;;  %v132_v39 = vshra.s32 %v724_v5, 3  ;;  %v118_v41 = vadd.s32 16, %v724_v5  ;;  %v119_v42 = vadd.s32 24, %v724_v5  ;;  %s612_s12 = scalar_lea.vmem %s358_s11, 32  ;;  %p617_p9 = scmp.lt.s32.totalorder %s358_s11, %s358_s11 }
  0x1a   :  { %v120_v43 = vadd.s32 32, %v724_v5  ;;  %v121_v44 = vadd.s32 40, %v724_v5  ;;  %v122_v57 = vadd.s32 48, %v724_v5  ;;  %v123_v58 = vadd.s32 56, %v724_v5  ;;  %p613_p8 = scmp.ne.s32.totalorder %s358_s11, %s612_s12  ;;  %p618_p10 = scmp.lt.s32.totalorder %s612_s12, %s612_s12 }
  0x1b   :  { %v133_v45 = vshra.s32 %v117_v38, 3  ;;  %vm148_vm6 = vcmp.eq.s32.totalorder %v132_v39, %v713_v1  ;;  %v134_v46 = vshra.s32 %v118_v41, 3  ;;  %v135_v47 = vshra.s32 %v119_v42, 3 }
  0x1c   :  { %45 = vrot.lane.b32.xlu0 %v38_v4, %s663_s28  ;;  %57 = vrot.lane.b32.xlu1 %v713_v1, %s665_s0  ;;  %v136_v50 = vshra.s32 %v120_v43, 3  ;;  %v137_v51 = vshra.s32 %v121_v44, 3  ;;  %v138_v59 = vshra.s32 %v122_v57, 3  ;;  %v139_v60 = vshra.s32 %v123_v58, 3  ;;  %p619_p11 = por %p618_p10, %p617_p9 }
  0x1d   :  { %vm149_vm7 = vcmp.eq.s32.totalorder %v133_v45, %v713_v1  ;;  %vm771_vm9 = vcmp.eq.s32.totalorder %v134_v46, %v713_v1  ;;  %vm776_vm10 = vcmp.eq.s32.totalorder %v135_v47, %v713_v1  ;;  %v124_v61 = vadd.s32 64, %v724_v5 }
  0x1e   :  { %vm524_vm8 = vmpackc.low %vm149_vm7, %vm148_vm6  ;;  %vm152_vm12 = vcmp.eq.s32.totalorder %v136_v50, %v713_v1  ;;  %vm153_vm13 = vcmp.eq.s32.totalorder %v137_v51, %v713_v1  ;;  %vm154_vm15 = vcmp.eq.s32.totalorder %v138_v59, %v713_v1  ;;  %v125_v62 = vadd.s32 72, %v724_v5  ;;  %p620_p12 = pnand %p619_p11, %p613_p8 }
  0x1f   :  { %549 = vmatpush3.bf16.msk.msra.mxu0 %vm524_vm8, %v671_v54  ;;  %525 = vmatpush3.bf16.msk.msra.mxu1 %vm524_vm8, %v671_v54  ;;  %vm527_vm11 = vmpackc.low %vm776_vm10, %vm771_vm9  ;;  %v140_v63 = vshra.s32 %v124_v61, 3  ;;  %v126_v2 = vadd.s32 80, %v724_v5  ;;  %v127_v3 = vadd.s32 88, %v724_v5 }
  0x20   :  { %550 = vmatprep.subr.bf16.mxu0 %v670_v40  ;;  %526 = vmatprep.subr.bf16.mxu1 %v670_v40  ;;  %vm530_vm14 = vmpackc.low %vm153_vm13, %vm152_vm12  ;;  %v141_v0 = vshra.s32 %v125_v62, 3  ;;  %vm672_vm12 = vmmov 0  }
  0x23   :  { %552 = vmatpush3.bf16.msk.msra.mxu0 %vm527_vm11, %v671_v54  ;;  %528 = vmatpush3.bf16.msk.msra.mxu1 %vm527_vm11, %v671_v54 }
  0x24   :  { %553 = vmatprep.subr.bf16.mxu0 %v670_v40  ;;  %529 = vmatprep.subr.bf16.mxu1 %v670_v40 }
  0x27   :  { %555 = vmatpush3.bf16.msk.msra.mxu0 %vm530_vm14, %v671_v54  ;;  %531 = vmatpush3.bf16.msk.msra.mxu1 %vm530_vm14, %v671_v54 }
  0x28   :  { %556 = vmatprep.subr.bf16.mxu0 %v670_v40  ;;  %532 = vmatprep.subr.bf16.mxu1 %v670_v40 }
  0x8a   :  { %v42_v8 = vpop.permute.xlu0 %41  ;;  %v48_v13 = vpop.permute.xlu1 %47 }
  0x8b   :  { %vm44_vm0 = vcmp.eq.s32.totalorder %v42_v8, %v43_v6  ;;  %v129_v6 = vadd.s32 104, %v724_v5  ;;  %v131_v8 = vadd.s32 120, %v724_v5 }
  0x8c   :  { %v49_v10 = vsel %vm44_vm0, 1, %v666_v9  ;;  %vm155_vm0 = vcmp.eq.s32.totalorder %v139_v60, %v713_v1 }
  0x8d   :  { %v53_v11 = vrot.slane %v49_v10, %v52_v7  ;;  %v143_v10 = vshra.s32 %v127_v3, 3  ;;  %v145_v12 = vshra.s32 %v129_v6, 3 }
  0x8e   :  { %v46_v14 = vpop.permute.xlu0 %45  ;;  %v58_v18 = vpop.permute.xlu1 %57 }
  0x8f   :  { %vm728_vm1 = vcmp.eq.s32.totalorder %v53_v11, 1  ;;  %vm60_vm2 = vcmp.eq.s32.totalorder %v58_v18, %v59_v17  ;;  %vm829_vm8 = vcmp.eq.s32.totalorder %v143_v10, %v713_v1  ;;  %vm845_vm11 = vcmp.eq.s32.totalorder %v145_v12, %v713_v1 }
  0x90   :  { %v55_v15 = vsel %vm728_vm1, %v46_v14, %v48_v13  ;;  %v65_v19 = vsel %vm60_vm2, 1, %v666_v9  ;;  %vm156_vm2 = vcmp.eq.s32.totalorder %v140_v63, %v713_v1 }
  0x91   :  { %v56_v16 = vmax.f32 %v38_v4, %v55_v15  ;;  %v69_v20 = vrot.slane %v65_v19, %v52_v7  ;;  %v147_v19 = vshra.s32 %v131_v8, 3 }
  0x93   :  { %63 = vrot.lane.b32.xlu1 %v56_v16, %s667_s1  ;;  %61 = vrot.lane.b32.xlu0 %v56_v16, %s665_s0  ;;  %vm739_vm3 = vcmp.eq.s32.totalorder %v69_v20, 1  ;;  %v673_v20 = vmov 0.0   ;;  %vm163_vm14 = vcmp.eq.s32.totalorder %v147_v19, %v713_v1 }
  0x94   :  { %520 = vmatprep.mubr.msk.f32.mxu0 %vm672_vm12, %v673_v20  ;;  %485 = vmatprep.mubr.msk.f32.mxu1 %vm672_vm12, %v673_v20 }
  0x97   :  { %73 = vrot.lane.b32.xlu0 %v713_v1, %s668_s6 }
 0x105   :  { %v64_v22 = vpop.permute.xlu1 %63  ;;  %v62_v23 = vpop.permute.xlu0 %61 }
 0x106   :  { %v71_v24 = vsel %vm739_vm3, %v62_v23, %v64_v22 }
 0x107   :  { %v72_v25 = vmax.f32 %v56_v16, %v71_v24 }
 0x109   :  { %79 = vrot.lane.b32.xlu0 %v72_v25, %s669_s7  ;;  %77 = vrot.lane.b32.xlu1 %v72_v25, %s668_s6  ;;  %v74_v27 = vpop.permute.xlu0 %73 }
 0x10a   :  { %vm76_vm4 = vcmp.eq.s32.totalorder %v74_v27, %v75_v26  ;;  %v113_v27 = vld [vmem:[%s901_s2] sm:$0x3] }
 0x10b   :  { %v81_v28 = vsel %vm76_vm4, 1, %v666_v9  ;;  %vm157_vm4 = vcmp.eq.s32.totalorder %v141_v0, %v713_v1  ;;  %v142_v9 = vshra.s32 %v126_v2, 3 }
 0x10c   :  { %v85_v29 = vrot.slane %v81_v28, %v52_v7  ;;  %v130_v7 = vadd.s32 112, %v724_v5  ;;  %vm536_vm6 = vmpackc.low %vm157_vm4, %vm156_vm2 }
 0x10d   :  { %vm824_vm7 = vcmp.eq.s32.totalorder %v142_v9, %v713_v1 }
 0x10e   :  { %vm748_vm5 = vcmp.eq.s32.totalorder %v85_v29, 1  ;;  %vm539_vm9 = vmpackc.low %vm829_vm8, %vm824_vm7  ;;  %v146_v18 = vshra.s32 %v130_v7, 3 }
 0x17b   :  { %v78_v31 = vpop.permute.xlu1 %77  ;;  %v80_v32 = vpop.permute.xlu0 %79 }
 0x17c   :  { %v87_v33 = vsel %vm748_vm5, %v78_v31, %v80_v32 }
 0x17d   :  { %v88_v34 = vmax.f32 %v72_v25, %v87_v33 }
 0x17f   :  { %v89_v35 = vsub.f32 %v38_v4, %v88_v34  ;;  %v128_v4 = vadd.s32 96, %v724_v5 }
 0x181   :  { %v90_v36 = vmul.f32 1.442695, %v89_v35  ;;  %v144_v11 = vshra.s32 %v128_v4, 3 }
 0x183   :  { %586 = vpow2.f32 %v90_v36  ;;  %vm840_vm10 = vcmp.eq.s32.totalorder %v144_v11, %v713_v1 }
 0x184   :  { %vm542_vm13 = vmpackc.low %vm845_vm11, %vm840_vm10 }
 0x18d   :  { %v754_v37 = vpop.eup %586 }
 0x18e   :  { %94 = vrot.lane.b32.xlu0 %v754_v37, %s664_s5  ;;  %92 = vrot.lane.b32.xlu1 %v754_v37, %s663_s28 }
 0x200   :  { %v95_v52 = vpop.permute.xlu0 %94  ;;  %v93_v53 = vpop.permute.xlu1 %92 }
 0x201   :  { %v96_v55 = vsel %vm728_vm1, %v93_v53, %v95_v52  ;;  %vm533_vm1 = vmpackc.low %vm155_vm0, %vm154_vm15 }
 0x202   :  { %v97_v56 = vadd.f32 %v754_v37, %v96_v55  ;;  %558 = vmatpush3.bf16.msk.msra.mxu0 %vm533_vm1, %v671_v54  ;;  %534 = vmatpush3.bf16.msk.msra.mxu1 %vm533_vm1, %v671_v54 }
 0x203   :  { %559 = vmatprep.subr.bf16.mxu0 %v670_v40  ;;  %535 = vmatprep.subr.bf16.mxu1 %v670_v40 }
 0x204   :  { %100 = vrot.lane.b32.xlu0 %v97_v56, %s667_s1  ;;  %98 = vrot.lane.b32.xlu1 %v97_v56, %s665_s0 }
 0x206   :  { %561 = vmatpush3.bf16.msk.msra.mxu0 %vm536_vm6, %v671_v54  ;;  %537 = vmatpush3.bf16.msk.msra.mxu1 %vm536_vm6, %v671_v54 }
 0x207   :  { %562 = vmatprep.subr.bf16.mxu0 %v670_v40  ;;  %538 = vmatprep.subr.bf16.mxu1 %v670_v40 }
 0x20a   :  { %564 = vmatpush3.bf16.msk.msra.mxu0 %vm539_vm9, %v671_v54  ;;  %540 = vmatpush3.bf16.msk.msra.mxu1 %vm539_vm9, %v671_v54 }
 0x20b   :  { %565 = vmatprep.subr.bf16.mxu0 %v670_v40  ;;  %541 = vmatprep.subr.bf16.mxu1 %v670_v40 }
 0x20e   :  { %567 = vmatpush3.bf16.msk.msra.mxu0 %vm542_vm13, %v671_v54  ;;  %543 = vmatpush3.bf16.msk.msra.mxu1 %vm542_vm13, %v671_v54 }
 0x20f   :  { %568 = vmatprep.subr.bf16.mxu0 %v670_v40  ;;  %544 = vmatprep.subr.bf16.mxu1 %v670_v40 }
 0x276   :  { %v101_v14 = vpop.permute.xlu0 %100  ;;  %v99_v15 = vpop.permute.xlu1 %98 }
 0x277   :  { %v102_v22 = vsel %vm739_vm3, %v99_v15, %v101_v14  ;;  %vm162_vm3 = vcmp.eq.s32.totalorder %v146_v18, %v713_v1 }
 0x278   :  { %v103_v23 = vadd.f32 %v102_v22, %v97_v56  ;;  %vm545_vm15 = vmpackc.low %vm163_vm14, %vm162_vm3 }
 0x279   :  { %570 = vmatpush3.bf16.msk.msra.mxu0 %vm545_vm15, %v671_v54  ;;  %546 = vmatpush3.bf16.msk.msra.mxu1 %vm545_vm15, %v671_v54 }
 0x27a   :  { %106 = vrot.lane.b32.xlu0 %v103_v23, %s669_s7  ;;  %104 = vrot.lane.b32.xlu1 %v103_v23, %s668_s6 }
 0x2ec   :  { %v107_v21 = vpop.permute.xlu0 %106  ;;  %v105_v24 = vpop.permute.xlu1 %104 }
 0x2ed   :  { %v108_v25 = vsel %vm748_vm5, %v105_v24, %v107_v21 }
 0x2ee   :  { %v109_v26 = vadd.f32 %v108_v25, %v103_v23 }
 0x2f0   :  { %588 = vrcp.f32 %v109_v26 }
 0x2fa   :  { %v589_v1 = vpop.eup %588 }
 0x2fb   :  { %v111_v28 = vmul.f32 %v589_v1, %v754_v37 }
 0x2fd   :  { %v114_v29 = vmul.f32 %v113_v27, %v111_v28  ;;  %112 = vst [vmem:[#allocation6] sm:$0x3] %v111_v28 }
 0x2ff   :  { %v196_v31 = vpack.c.bf16 %v114_v29, %v114_v29 }
 0x301   :  { %v197_v32 = vunpack.c.l.bf16 %v196_v31 }
 0x303   :  { %521 = vmatmul.mubr.f32.vlgmr.msra.gmra.mrb[0].mxu0 %v197_v32  ;;  %v198_v33 = vsub.f32 %v114_v29, %v197_v32 }
 0x305   :  { %486 = vmatmul.mubr.f32.vlgmr.msra.gmra.mrb[0].mxu1 %v198_v33 }
 0x306   :  { %623 = shalt.err (!%p620_p12)
}
 0x307   :  { %s624_s14 = scalar_lea.hbm %s903_s4, 32 }
 0x308   :  { %p625_p13 = scmp.ne.s32.totalorder %s903_s4, %s624_s14  ;;  %p628_p0 = scmp.lt.u32.totalorder %s624_s14, %s903_s4 }
 0x30a   :  { %p630_p1 = pnand %p628_p0, %p625_p13 }
 0x30c   :  { %633 = shalt.err (!%p630_p1)
}
 0x30d   :  { %360 = dma.vmem_to_hbm [thread:$0]  %s358_s11, 32, %s903_s4, [#allocation7]   ;;  %vm339_vm5 = vcmask 123904  }
 0x30e   :  { %s675_s21 = smov [#allocation5]  }
 0x30f   :  { %s347_s22 = sshll.u32 %s675_s21, 4  ;;  %s348_s22 = int_to_ptr.vmem [resolvable:$true] %s347_s22 }
 0x310   :  { %s634_s23 = scalar_lea.vmem %s348_s22, 32  ;;  %p639_p3 = scmp.lt.s32.totalorder %s348_s22, %s348_s22 }
 0x311   :  { %p635_p2 = scmp.ne.s32.totalorder %s348_s22, %s634_s23  ;;  %p640_p4 = scmp.lt.s32.totalorder %s634_s23, %s634_s23 }
 0x313   :  { %p641_p5 = por %p640_p4, %p639_p3 }
 0x315   :  { %p642_p6 = pnand %p641_p5, %p635_p2 }
 0x3d6   :  { %v335_v30 = vpop.f32.mrb[0].mxu0 }
 0x3d7   :  { %v522_v34 = vpop.f32.mrb[1].mxu0 }
 0x3d8   :  { %v265_v35 = vpop.f32.mrb[0].mxu1 }
 0x3d9   :  { %v336_v36 = vadd.f32 %v335_v30, %v265_v35  ;;  %v487_v37 = vpop.f32.mrb[1].mxu1 }
 0x3db   :  { %340 = vst.msk [vmem:[#allocation5] sm:$0x3] %vm339_vm5, %v336_v36 }
 0x3dc   :  { %645 = shalt.err (!%p642_p6)
}
 0x3dd   :  { %s646_s4 = scalar_lea.hbm %s902_s3, 32 }
 0x3de   :  { %p647_p7 = scmp.ne.s32.totalorder %s902_s3, %s646_s4  ;;  %p650_p8 = scmp.lt.u32.totalorder %s646_s4, %s902_s3 }
 0x3e0   :  { %p652_p9 = pnand %p650_p8, %p647_p7 }
 0x3e2   :  { %655 = shalt.err (!%p652_p9)
}
 0x3e3   :  { %350 = dma.vmem_to_hbm [thread:$0]  %s348_s22, 32, %s902_s3, [#allocation4]  }
 0x3e4   :  { %658 = dma.done.wait [#allocation4], 32  }
 0x3e5   :  { %659 = vsyncadd [#allocation4], 4294967264 }
 0x3e6   :  { %660 = dma.done.wait [#allocation7], 32  }
 0x3e7   :  { %661 = vsyncadd [#allocation7], 4294967264 }
 0x3e8   :  { %367 = vsyncpa [#allocation3], 1 }
 0x3e9   :  { %368 = vsyncpa [#allocation4], 1 }
 0x3ea   :  { %369 = vsyncpa [#allocation7], 1 }

</bundles_post_ra>
